<compile_context>
chip_gen: v5e
topology: v5e:2x2
jax: 0.10.0
libtpu: 0.0.40
codegen_flags: <defaults>
</compile_context>

<pallas_src>
import functools

import jax
import jax.numpy as jnp
from jax.experimental import pallas as pl
from jax.experimental.pallas import tpu as pltpu

LANE = 128
SUBLANE = 8
MAX_TILE_ROWS = 2048   # (2048, 128) f32 block = 1 MiB per input per buffer
NSPLIT = 2             # leading "parallel" grid axis (v7x has 2 TensorCores)


def _cdiv(a, b):
    return -(-a // b)


def _round_up(a, b):
    return _cdiv(a, b) * b


def _relative_l2_sum_kernel(x_ref, t_ref, out_ref, acc_ref, *,
                            n_valid, inner_steps, needs_mask):
    """Accumulates per-chunk partial sums of x and t into out_ref[p]."""
    p = pl.program_id(0)          # chunk (parallel axis)
    i = pl.program_id(1)          # step within chunk (reduction axis)

    @pl.when(i == 0)
    def _():
        acc_ref[...] = jnp.zeros_like(acc_ref)

    x = x_ref[...].astype(jnp.float32)
    t = t_ref[...].astype(jnp.float32)

    if needs_mask:
        # Mask elements past the true tensor size (ragged last block and/or
        # clamped duplicate tiles when the tile count does not divide NSPLIT).
        tr, ln = x_ref.shape
        base = (p * inner_steps + i) * (tr * ln)
        row_ids = jax.lax.broadcasted_iota(jnp.int32, (tr, ln), 0)
        lane_ids = jax.lax.broadcasted_iota(jnp.int32, (tr, ln), 1)
        idx = base + row_ids * ln + lane_ids
        valid = idx < n_valid
        x = jnp.where(valid, x, 0.0)
        t = jnp.where(valid, t, 0.0)

    # Element-wise accumulation into an (8, 128) vreg-shaped accumulator per
    # input (VPU adds only; no per-step cross-lane reduce).
    r = x.shape[0] // SUBLANE
    acc_ref[0] += jnp.sum(x.reshape(r, SUBLANE, LANE), axis=0)
    acc_ref[1] += jnp.sum(t.reshape(r, SUBLANE, LANE), axis=0)

    @pl.when(i == pl.num_programs(1) - 1)
    def _():
        # One sublane reduce at the very end -> (2, 128) lane partials.
        out_ref[...] = jnp.sum(acc_ref[...], axis=1)[None]


def _as_rows(x, rows_p):
    """Flatten to (rows_p, LANE); zero-pad only the (tiny) ragged remainder."""
    n = x.size
    flat = x.reshape(-1)                       # contiguous reshape: no copy
    padded = rows_p * LANE
    if padded != n:                            # copies only for ragged sizes
        flat = jnp.pad(flat, (0, padded - n))
    return flat.reshape(rows_p, LANE)


def relative_l2(inp, target, eps=0.01, *, max_tile_rows=MAX_TILE_ROWS):
    """Pallas implementation of RelativeL2 forward. Returns a scalar f32."""
    assert inp.shape == target.shape, (inp.shape, target.shape)
    n = int(inp.size)
    assert 0 < n < 2 ** 31  # int32 element indexing inside the kernel

    # ---- static tiling math -------------------------------------------------
    rows_p = _round_up(max(_cdiv(n, LANE), 1), SUBLANE)      # >= 8, mult of 8
    max_tile_rows = max(SUBLANE, (max_tile_rows // SUBLANE) * SUBLANE)
    tile_rows = min(max_tile_rows, rows_p)                   # multiple of 8
    tiles_total = _cdiv(rows_p, tile_rows)
    nsplit = min(NSPLIT, tiles_total)
    inner_steps = _cdiv(tiles_total, nsplit)
    # Mask only when the last block is partial or some steps are clamped
    # duplicates (zero-padded tail inside the array needs no mask).
    needs_mask = (rows_p % tile_rows != 0) or (tiles_total % nsplit != 0)

    x2d = _as_rows(inp, rows_p)
    t2d = _as_rows(target, rows_p)

    def in_index_map(p, i):
        # Clamp so clamped (fully-masked) steps never DMA out of bounds.
        return (jnp.minimum(p * inner_steps + i, tiles_total - 1), 0)

    partials = pl.pallas_call(
        functools.partial(
            _relative_l2_sum_kernel,
            n_valid=n,
            inner_steps=inner_steps,
            needs_mask=needs_mask,
        ),
        out_shape=jax.ShapeDtypeStruct((nsplit, 2, LANE), jnp.float32),
        grid_spec=pltpu.PrefetchScalarGridSpec(
            num_scalar_prefetch=0,
            grid=(nsplit, inner_steps),
            in_specs=[
                pl.BlockSpec((tile_rows, LANE), in_index_map),
                pl.BlockSpec((tile_rows, LANE), in_index_map),
            ],
            out_specs=pl.BlockSpec((1, 2, LANE), lambda p, i: (p, 0, 0)),
            scratch_shapes=[
                pltpu.VMEM((2, SUBLANE, LANE), jnp.float32),
            ],
        ),
        compiler_params=pltpu.CompilerParams(
            dimension_semantics=("parallel", "arbitrary"),
        ),
    )(x2d, t2d)

    # Tiny epilogue on (nsplit, 2, 128) partials — done in plain JAX.
    s_x = jnp.sum(partials[:, 0, :])
    s_t = jnp.sum(partials[:, 1, :])
    base = s_t + jnp.float32(eps)
    return (s_x / base - s_t / base) ** 2


def relative_l2_ref(inp, target, eps=0.01):
    base = jnp.sum(target) + eps
    return (jnp.sum(inp) / base - jnp.sum(target) / base) ** 2


if __name__ == "__main__":
    key = jax.random.PRNGKey(0)
    k1, k2, k3, k4, k5, k6 = jax.random.split(key, 6)

    # Case 1: NCHW batch=2, channels=4, spatial=16 (numel divides 8*128).
    x1 = jax.random.uniform(k1, (2, 4, 16, 16), dtype=jnp.float32)
    t1 = jax.random.uniform(k2, (2, 4, 16, 16), dtype=jnp.float32) * 0.5
    l1 = relative_l2(x1, t1, eps=0.01)
    jax.block_until_ready(l1)
    r1 = relative_l2_ref(x1, t1, eps=0.01)
    assert jnp.allclose(l1, r1, rtol=1e-4, atol=1e-6), (l1, r1)

    # Case 2: ragged size (FashionMNIST-like 28x28, numel not a multiple of 128).
    x2 = jax.random.uniform(k3, (3, 1, 28, 28), dtype=jnp.float32)
    t2 = jax.random.uniform(k4, (3, 1, 28, 28), dtype=jnp.float32) * 0.5
    l2 = relative_l2(x2, t2, eps=0.01)
    jax.block_until_ready(l2)
    r2 = relative_l2_ref(x2, t2, eps=0.01)
    assert jnp.allclose(l2, r2, rtol=1e-4, atol=1e-6), (l2, r2)

    # Case 3: force tiny tiles so the multi-tile / 2-way-split / masked-tail
    # paths (the ones large inputs hit with the default tile) are exercised.
    x3 = jax.random.uniform(k5, (2, 4, 16, 20), dtype=jnp.float32)
    t3 = jax.random.uniform(k6, (2, 4, 16, 20), dtype=jnp.float32) * 0.5
    l3 = relative_l2(x3, t3, eps=0.01, max_tile_rows=8)
    jax.block_until_ready(l3)
    r3 = relative_l2_ref(x3, t3, eps=0.01)
    assert jnp.allclose(l3, r3, rtol=1e-4, atol=1e-6), (l3, r3)

    print("KERNEL_OK")
</pallas_src>

<mosaic_0001>
module attributes {stable_mosaic.version = 11 : i64} {
  func.func @_relative_l2_sum_kernel(%arg0: i32, %arg1: i32, %arg2: memref<16x128xf32, #tpu.memory_space<vmem>>, %arg3: memref<16x128xf32, #tpu.memory_space<vmem>>, %arg4: memref<1x2x128xf32, #tpu.memory_space<vmem>>, %arg5: memref<2x8x128xf32, #tpu.memory_space<vmem>>) attributes {dimension_semantics = [#tpu.dimension_semantics<parallel>, #tpu.dimension_semantics<arbitrary>], iteration_bounds = array<i64: 1, 1>, scalar_prefetch = 0 : i64, scratch_operands = 1 : i64, tpu.core_type = #tpu.core_type<tc>, window_params = [{transform_indices = @transform_0, window_bounds = array<i64: 16, 128>}, {transform_indices = @transform_1, window_bounds = array<i64: 16, 128>}, {transform_indices = @transform_2, window_bounds = array<i64: 1, 2, 128>}]} {
    %c0_i32 = arith.constant 0 : i32
    %0 = arith.cmpi eq, %arg1, %c0_i32 : i32
    %1 = arith.extui %0 : i1 to i32
    %c0_i32_0 = arith.constant 0 : i32
    %2 = arith.cmpi ne, %1, %c0_i32_0 : i32
    scf.if %2 {
      %cst_18 = arith.constant 0.000000e+00 : f32
      %24 = vector.broadcast %cst_18 : f32 to vector<2x8x128xf32>
      %c0_19 = arith.constant 0 : index
      %c0_20 = arith.constant 0 : index
      %c0_21 = arith.constant 0 : index
      %25 = vector.load %arg5[%c0_19, %c0_20, %c0_21] : memref<2x8x128xf32, #tpu.memory_space<vmem>>, vector<2x8x128xf32>
      tpu.vector_store %arg5[%c0_19, %c0_20, %c0_21], %24 {strides = array<i32>} : memref<2x8x128xf32, #tpu.memory_space<vmem>>, vector<2x8x128xf32>,
    } else {
    }
    %c0 = arith.constant 0 : index
    %c0_1 = arith.constant 0 : index
    %3 = vector.load %arg2[%c0, %c0_1] : memref<16x128xf32, #tpu.memory_space<vmem>>, vector<16x128xf32>
    %c0_2 = arith.constant 0 : index
    %c0_3 = arith.constant 0 : index
    %4 = vector.load %arg3[%c0_2, %c0_3] : memref<16x128xf32, #tpu.memory_space<vmem>>, vector<16x128xf32>
    %c0_4 = arith.constant 0 : index
    %c0_5 = arith.constant 0 : index
    %c0_6 = arith.constant 0 : index
    %5 = vector.load %arg5[%c0_4, %c0_5, %c0_6] : memref<2x8x128xf32, #tpu.memory_space<vmem>>, vector<1x8x128xf32>
    %6 = vector.shape_cast %5 : vector<1x8x128xf32> to vector<8x128xf32>
    %7 = vector.shape_cast %3 : vector<16x128xf32> to vector<2x8x128xf32>
    %cst = arith.constant dense<0.000000e+00> : vector<8x128xf32>
    %8 = vector.multi_reduction <add>, %7, %cst [0] : vector<2x8x128xf32> to vector<8x128xf32>
    %9 = arith.addf %6, %8 : vector<8x128xf32>
    %c0_7 = arith.constant 0 : index
    %c0_8 = arith.constant 0 : index
    %c0_9 = arith.constant 0 : index
    %10 = vector.load %arg5[%c0_7, %c0_8, %c0_9] : memref<2x8x128xf32, #tpu.memory_space<vmem>>, vector<1x8x128xf32>
    %11 = vector.shape_cast %10 : vector<1x8x128xf32> to vector<8x128xf32>
    %12 = vector.shape_cast %9 : vector<8x128xf32> to vector<1x8x128xf32>
    tpu.vector_store %arg5[%c0_7, %c0_8, %c0_9], %12 {strides = array<i32>} : memref<2x8x128xf32, #tpu.memory_space<vmem>>, vector<1x8x128xf32>,
    %c1 = arith.constant 1 : index
    %c0_10 = arith.constant 0 : index
    %c0_11 = arith.constant 0 : index
    %13 = vector.load %arg5[%c1, %c0_10, %c0_11] : memref<2x8x128xf32, #tpu.memory_space<vmem>>, vector<1x8x128xf32>
    %14 = vector.shape_cast %13 : vector<1x8x128xf32> to vector<8x128xf32>
    %15 = vector.shape_cast %4 : vector<16x128xf32> to vector<2x8x128xf32>
    %cst_12 = arith.constant dense<0.000000e+00> : vector<8x128xf32>
    %16 = vector.multi_reduction <add>, %15, %cst_12 [0] : vector<2x8x128xf32> to vector<8x128xf32>
    %17 = arith.addf %14, %16 : vector<8x128xf32>
    %c1_13 = arith.constant 1 : index
    %c0_14 = arith.constant 0 : index
    %c0_15 = arith.constant 0 : index
    %18 = vector.load %arg5[%c1_13, %c0_14, %c0_15] : memref<2x8x128xf32, #tpu.memory_space<vmem>>, vector<1x8x128xf32>
    %19 = vector.shape_cast %18 : vector<1x8x128xf32> to vector<8x128xf32>
    %20 = vector.shape_cast %17 : vector<8x128xf32> to vector<1x8x128xf32>
    tpu.vector_store %arg5[%c1_13, %c0_14, %c0_15], %20 {strides = array<i32>} : memref<2x8x128xf32, #tpu.memory_space<vmem>>, vector<1x8x128xf32>,
    %c0_i32_16 = arith.constant 0 : i32
    %21 = arith.cmpi eq, %arg1, %c0_i32_16 : i32
    %22 = arith.extui %21 : i1 to i32
    %c0_i32_17 = arith.constant 0 : i32
    %23 = arith.cmpi ne, %22, %c0_i32_17 : i32
    scf.if %23 {
      %c0_18 = arith.constant 0 : index
      %c0_19 = arith.constant 0 : index
      %c0_20 = arith.constant 0 : index
      %24 = vector.load %arg5[%c0_18, %c0_19, %c0_20] : memref<2x8x128xf32, #tpu.memory_space<vmem>>, vector<2x8x128xf32>
      %cst_21 = arith.constant dense<0.000000e+00> : vector<2x128xf32>
      %25 = vector.multi_reduction <add>, %24, %cst_21 [1] : vector<2x8x128xf32> to vector<2x128xf32>
      %26 = vector.shape_cast %25 : vector<2x128xf32> to vector<1x2x128xf32>
      %c0_22 = arith.constant 0 : index
      %c0_23 = arith.constant 0 : index
      %c0_24 = arith.constant 0 : index
      %27 = vector.load %arg4[%c0_22, %c0_23, %c0_24] : memref<1x2x128xf32, #tpu.memory_space<vmem>>, vector<1x2x128xf32>
      tpu.vector_store %arg4[%c0_22, %c0_23, %c0_24], %26 {strides = array<i32>} : memref<1x2x128xf32, #tpu.memory_space<vmem>>, vector<1x2x128xf32>,
    } else {
    }
    return
  }
  func.func @transform_0(%arg0: i32, %arg1: i32) -> (i32, i32) {
    %c1_i32 = arith.constant 1 : i32
    %0 = arith.muli %arg0, %c1_i32 : i32
    %1 = arith.addi %0, %arg1 : i32
    %c0_i32 = arith.constant 0 : i32
    %2 = arith.minsi %1, %c0_i32 : i32
    %c0_i32_0 = arith.constant 0 : i32
    %c0_i32_1 = arith.constant 0 : i32
    return %2, %c0_i32_0 : i32, i32
  }
  func.func @transform_1(%arg0: i32, %arg1: i32) -> (i32, i32) {
    %c1_i32 = arith.constant 1 : i32
    %0 = arith.muli %arg0, %c1_i32 : i32
    %1 = arith.addi %0, %arg1 : i32
    %c0_i32 = arith.constant 0 : i32
    %2 = arith.minsi %1, %c0_i32 : i32
    %c0_i32_0 = arith.constant 0 : i32
    %c0_i32_1 = arith.constant 0 : i32
    return %2, %c0_i32_0 : i32, i32
  }
  func.func @transform_2(%arg0: i32, %arg1: i32) -> (i32, i32, i32) {
    %c0_i32 = arith.constant 0 : i32
    %c0_i32_0 = arith.constant 0 : i32
    %c0_i32_1 = arith.constant 0 : i32
    return %arg0, %c0_i32, %c0_i32_0 : i32, i32, i32
  }
}

</mosaic_0001>

<bundles_post_ra>
// kernel: tpu_custom_call.1
= control target key start
LH: loop header
LB: loop body
LE: loop exit
PB: predicated region body
PF: predicated region fallthrough
CT: control target
= control target key end

     0   :  { %7 = vsyncpa [#allocation4], 0  ;;  %s240_s0 = inlined_call_operand.hbm [shape: f32[16,128], index: 0, kind: input, shape index: {}]   ;;  %s241_s1 = inlined_call_operand.hbm [shape: f32[16,128], index: 1, kind: input, shape index: {}]   ;;  %s242_s2 = inlined_call_operand.hbm [shape: f32[1,2,128], index: 2, kind: output, shape index: {}]  }
   0x1   :  { %8 = vsyncpa [#allocation7], 0 }
   0x2   :  { %9 = vsyncpa [#allocation5], 0  ;;  %s20_s11 = sshll.u32 %s240_s0, 4  ;;  %s211_s12 = smov [#allocation3]   ;;  %s21_s11 = int_to_ptr.hbm [resolvable:$true] %s20_s11 }
   0x3   :  { %s22_s13 = sshll.u32 %s211_s12, 4  ;;  %s39_s16 = sshll.u32 %s241_s1, 4  ;;  %s23_s13 = int_to_ptr.vmem [resolvable:$true] %s22_s13  ;;  %s40_s16 = int_to_ptr.hbm [resolvable:$true] %s39_s16 }
   0x4   :  { %s212_s17 = smov 128   ;;  %s213_s18 = smov 8  }
   0x5   :  { %28 = dma.hbm_to_vmem [thread:$0]  %s21_s11, 256, %s23_s13, [#allocation4], %s212_s17, %s212_s17, %s213_s18  }
   0x6   :  { %s214_s19 = smov [#allocation6]  }
   0x7   :  { %s41_s20 = sshll.u32 %s214_s19, 4  ;;  %s42_s20 = int_to_ptr.vmem [resolvable:$true] %s41_s20 }
   0x8   :  { %47 = dma.hbm_to_vmem [thread:$0]  %s40_s16, 256, %s42_s20, [#allocation7], %s212_s17, %s212_s17, %s213_s18  }
   0x9   :  { %205 = dma.done.wait [#allocation4], 256  }
   0xa   :  { %206 = vsyncadd [#allocation4], 4294967040 }
   0xb   :  { %207 = dma.done.wait [#allocation7], 256  }
   0xc   :  { %208 = vsyncadd [#allocation7], 4294967040  ;;  %v70_v0 = vld [vmem:[#allocation3] sm:$0xff]  ;;  %v71_v1 = vld [vmem:[#allocation3 + $0x8] sm:$0xff]  ;;  %s215_s0 = smov [#allocation8]   ;;  %s113_s23 = sshll.u32 %s242_s2, 4  ;;  %s114_s23 = int_to_ptr.hbm [resolvable:$true] %s113_s23 }
   0xd   :  { %v72_v2 = vld [vmem:[#allocation6] sm:$0xff]  ;;  %v73_v3 = vld [vmem:[#allocation6 + $0x8] sm:$0xff]  ;;  %v75_v4 = vadd.f32 %v71_v1, %v70_v0  ;;  %s111_s1 = sshll.u32 %s215_s0, 4  ;;  %vm102_vm0 = vcmask 1041409   ;;  %s112_s1 = int_to_ptr.vmem [resolvable:$true] %s111_s1 }
   0xe   :  { %v80_v5 = vadd.f32 %v73_v3, %v72_v2 }
   0xf   :  { %v88_v6 = vrot.slane %v75_v4, 4 }
  0x10   :  { %v94_v7 = vrot.slane %v80_v5, 4 }
  0x11   :  { %v89_v8 = vadd.f32 %v88_v6, %v75_v4 }
  0x12   :  { %v95_v9 = vadd.f32 %v94_v7, %v80_v5 }
  0x13   :  { %v90_v10 = vrot.slane %v89_v8, 2 }
  0x14   :  { %v96_v11 = vrot.slane %v95_v9, 2 }
  0x15   :  { %v91_v12 = vadd.f32 %v90_v10, %v89_v8 }
  0x16   :  { %v97_v13 = vadd.f32 %v96_v11, %v95_v9 }
  0x17   :  { %v92_v14 = vrot.slane %v91_v12, 1 }
  0x18   :  { %v98_v15 = vrot.slane %v97_v13, 1 }
  0x19   :  { %v93_v16 = vadd.f32 %v92_v14, %v91_v12 }
  0x1a   :  { %v99_v17 = vadd.f32 %v98_v15, %v97_v13 }
  0x1c   :  { %v103_v18 = vsel %vm102_vm0, %v99_v17, %v93_v16 }
  0x1d   :  { %105 = vst [vmem:[#allocation8] sm:$0x3] %v103_v18 }
  0x1e   :  { %116 = dma.vmem_to_hbm [thread:$0]  %s112_s1, 32, %s114_s23, [#allocation5]  }
  0x1f   :  { %209 = dma.done.wait [#allocation5], 32  }
  0x20   :  { %210 = vsyncadd [#allocation5], 4294967264 }
  0x21   :  { %121 = vsyncpa [#allocation4], 1 }
  0x22   :  { %122 = vsyncpa [#allocation7], 1 }
  0x23   :  { %123 = vsyncpa [#allocation5], 1 }

</bundles_post_ra>
